<compile_context>
chip_gen: v7x
topology: tpu7x:2x2x1
jax: 0.10.0
libtpu: 0.0.40
codegen_flags: <defaults>
</compile_context>

<pallas_src>
import math
from functools import partial

import jax
import jax.numpy as jnp
import numpy as np
from jax.experimental import pallas as pl
from jax.experimental.pallas import tpu as pltpu

# ----- module hyper-params (mirrors GaussianSmoothing.__init__) -----
CHANNELS = 4
KERNEL_SIZE = 3
SIGMA = 0.5
DIM = 2  # 2-D spatial


def make_gaussian_taps(kernel_size: int, sigma: float) -> np.ndarray:
    """Reproduces the (slightly non-standard) PyTorch weight construction exactly.

    kernel *= 1/(std*sqrt(2*pi)) * exp(-((mgrid - mean) / (2*std))**2)
    then normalized to sum to 1.  Returns shape (KH, KW) float32 — the module
    repeats this identical kernel over channels, so one copy suffices.
    """
    sizes = [kernel_size] * DIM
    sigmas = [sigma] * DIM
    grids = np.meshgrid(*[np.arange(s, dtype=np.float32) for s in sizes], indexing="ij")
    kernel = np.ones(sizes, dtype=np.float32)
    for size, std, mgrid in zip(sizes, sigmas, grids):
        mean = (size - 1) / 2.0
        kernel = kernel * (
            1.0 / (std * math.sqrt(2.0 * math.pi))
            * np.exp(-(((mgrid - mean) / (2.0 * std)) ** 2))
        )
    kernel = kernel / np.sum(kernel)
    return kernel.astype(np.float32)


def _smooth_kernel(x_ref, o_ref, *, taps, kh, kw):
    # x_ref: (N*C, H, W) -- whole input, resident in VMEM
    # o_ref: (N*C, H-kh+1, W-kw+1)
    # taps:  tuple-of-tuples of Python floats (compile-time immediates)
    x = x_ref[...]
    if x.dtype != jnp.float32:
        # f32 accumulate for narrow inputs (bf16 VALU only on v6e/v7x; v5e needs upcast)
        x = x.astype(jnp.float32)
    h_out = o_ref.shape[-2]
    w_out = o_ref.shape[-1]
    acc = None
    for di in range(kh):
        for dj in range(kw):
            term = taps[di][dj] * x[:, di:di + h_out, dj:dj + w_out]
            acc = term if acc is None else acc + term
    o_ref[...] = acc.astype(o_ref.dtype)


def gaussian_smoothing(x: jnp.ndarray, taps_np: np.ndarray) -> jnp.ndarray:
    """x: (N, C, H, W);  taps_np: (KH, KW) numpy constant.  Valid depthwise conv."""
    n, c, h, w = x.shape
    kh, kw = taps_np.shape
    h_out, w_out = h - kh + 1, w - kw + 1
    nc = n * c

    x3 = x.reshape(nc, h, w)
    taps = tuple(tuple(float(v) for v in row) for row in np.asarray(taps_np))

    out3 = pl.pallas_call(
        partial(_smooth_kernel, taps=taps, kh=kh, kw=kw),
        out_shape=jax.ShapeDtypeStruct((nc, h_out, w_out), x.dtype),
        # No grid: whole arrays live in VMEM for the single invocation.
        in_specs=[pl.BlockSpec(memory_space=pltpu.MemorySpace.VMEM)],
        out_specs=pl.BlockSpec(memory_space=pltpu.MemorySpace.VMEM),
    )(x3)
    return out3.reshape(n, c, h_out, w_out)


def _reference(x: jnp.ndarray, taps_np: np.ndarray) -> jnp.ndarray:
    # Plain-XLA reference: depthwise valid conv (groups = C), NCHW.
    c = x.shape[1]
    kh, kw = taps_np.shape
    w4 = jnp.broadcast_to(jnp.asarray(taps_np)[None, None, :, :], (c, 1, kh, kw))
    return jax.lax.conv_general_dilated(
        x, w4,
        window_strides=(1, 1), padding="VALID",
        dimension_numbers=("NCHW", "OIHW", "NCHW"),
        feature_group_count=c,
    )


if __name__ == "__main__":
    key = jax.random.PRNGKey(0)
    N, C, H, W = 2, CHANNELS, 16, 16
    x = jax.random.normal(key, (N, C, H, W), dtype=jnp.float32)

    taps = make_gaussian_taps(KERNEL_SIZE, SIGMA)

    out = gaussian_smoothing(x, taps)
    out = jax.block_until_ready(out)

    ref = jax.block_until_ready(_reference(x, taps))
    assert out.shape == (N, C, H - KERNEL_SIZE + 1, W - KERNEL_SIZE + 1), out.shape
    if not np.allclose(np.asarray(out), np.asarray(ref), rtol=1e-5, atol=1e-5):
        raise AssertionError("Pallas output does not match XLA depthwise-conv reference")

    print("KERNEL_OK")
</pallas_src>

<mosaic_0001>
module attributes {stable_mosaic.version = 11 : i64} {
  func.func @_smooth_kernel(%arg0: memref<8x16x16xf32, #tpu.memory_space<vmem>>, %arg1: memref<8x14x14xf32, #tpu.memory_space<vmem>>) attributes {dimension_semantics = [], scalar_prefetch = 0 : i64, scratch_operands = 0 : i64, tpu.core_type = #tpu.core_type<tc>} {
    %c0 = arith.constant 0 : index
    %c0_0 = arith.constant 0 : index
    %c0_1 = arith.constant 0 : index
    %0 = vector.load %arg0[%c0, %c0_0, %c0_1] : memref<8x16x16xf32, #tpu.memory_space<vmem>>, vector<8x16x16xf32>
    %1 = vector.extract_strided_slice %0 {offsets = [0, 0, 0], sizes = [8, 14, 14], strides = [1, 1, 1]} : vector<8x16x16xf32> to vector<8x14x14xf32>
    %cst = arith.constant 0.0449192226 : f32
    %2 = vector.broadcast %cst : f32 to vector<8x14x14xf32>
    %3 = arith.mulf %2, %1 : vector<8x14x14xf32>
    %4 = vector.extract_strided_slice %0 {offsets = [0, 0, 1], sizes = [8, 14, 14], strides = [1, 1, 1]} : vector<8x16x16xf32> to vector<8x14x14xf32>
    %cst_2 = arith.constant 0.12210311 : f32
    %5 = vector.broadcast %cst_2 : f32 to vector<8x14x14xf32>
    %6 = arith.mulf %5, %4 : vector<8x14x14xf32>
    %7 = arith.addf %3, %6 : vector<8x14x14xf32>
    %8 = vector.extract_strided_slice %0 {offsets = [0, 0, 2], sizes = [8, 14, 14], strides = [1, 1, 1]} : vector<8x16x16xf32> to vector<8x14x14xf32>
    %cst_3 = arith.constant 0.0449192226 : f32
    %9 = vector.broadcast %cst_3 : f32 to vector<8x14x14xf32>
    %10 = arith.mulf %9, %8 : vector<8x14x14xf32>
    %11 = arith.addf %7, %10 : vector<8x14x14xf32>
    %12 = vector.extract_strided_slice %0 {offsets = [0, 1, 0], sizes = [8, 14, 14], strides = [1, 1, 1]} : vector<8x16x16xf32> to vector<8x14x14xf32>
    %cst_4 = arith.constant 0.12210311 : f32
    %13 = vector.broadcast %cst_4 : f32 to vector<8x14x14xf32>
    %14 = arith.mulf %13, %12 : vector<8x14x14xf32>
    %15 = arith.addf %11, %14 : vector<8x14x14xf32>
    %16 = vector.extract_strided_slice %0 {offsets = [0, 1, 1], sizes = [8, 14, 14], strides = [1, 1, 1]} : vector<8x16x16xf32> to vector<8x14x14xf32>
    %cst_5 = arith.constant 0.3319107 : f32
    %17 = vector.broadcast %cst_5 : f32 to vector<8x14x14xf32>
    %18 = arith.mulf %17, %16 : vector<8x14x14xf32>
    %19 = arith.addf %15, %18 : vector<8x14x14xf32>
    %20 = vector.extract_strided_slice %0 {offsets = [0, 1, 2], sizes = [8, 14, 14], strides = [1, 1, 1]} : vector<8x16x16xf32> to vector<8x14x14xf32>
    %cst_6 = arith.constant 0.12210311 : f32
    %21 = vector.broadcast %cst_6 : f32 to vector<8x14x14xf32>
    %22 = arith.mulf %21, %20 : vector<8x14x14xf32>
    %23 = arith.addf %19, %22 : vector<8x14x14xf32>
    %24 = vector.extract_strided_slice %0 {offsets = [0, 2, 0], sizes = [8, 14, 14], strides = [1, 1, 1]} : vector<8x16x16xf32> to vector<8x14x14xf32>
    %cst_7 = arith.constant 0.0449192226 : f32
    %25 = vector.broadcast %cst_7 : f32 to vector<8x14x14xf32>
    %26 = arith.mulf %25, %24 : vector<8x14x14xf32>
    %27 = arith.addf %23, %26 : vector<8x14x14xf32>
    %28 = vector.extract_strided_slice %0 {offsets = [0, 2, 1], sizes = [8, 14, 14], strides = [1, 1, 1]} : vector<8x16x16xf32> to vector<8x14x14xf32>
    %cst_8 = arith.constant 0.12210311 : f32
    %29 = vector.broadcast %cst_8 : f32 to vector<8x14x14xf32>
    %30 = arith.mulf %29, %28 : vector<8x14x14xf32>
    %31 = arith.addf %27, %30 : vector<8x14x14xf32>
    %32 = vector.extract_strided_slice %0 {offsets = [0, 2, 2], sizes = [8, 14, 14], strides = [1, 1, 1]} : vector<8x16x16xf32> to vector<8x14x14xf32>
    %cst_9 = arith.constant 0.0449192226 : f32
    %33 = vector.broadcast %cst_9 : f32 to vector<8x14x14xf32>
    %34 = arith.mulf %33, %32 : vector<8x14x14xf32>
    %35 = arith.addf %31, %34 : vector<8x14x14xf32>
    %c0_10 = arith.constant 0 : index
    %c0_11 = arith.constant 0 : index
    %c0_12 = arith.constant 0 : index
    %36 = vector.load %arg1[%c0_10, %c0_11, %c0_12] : memref<8x14x14xf32, #tpu.memory_space<vmem>>, vector<8x14x14xf32>
    tpu.vector_store %arg1[%c0_10, %c0_11, %c0_12], %35 {strides = array<i32>} : memref<8x14x14xf32, #tpu.memory_space<vmem>>, vector<8x14x14xf32>,
    return
  }
}

</mosaic_0001>

<bundles_post_ra>
// kernel: tpu_custom_call.1
= control target key start
LH: loop header
LB: loop body
LE: loop exit
PB: predicated region body
PF: predicated region fallthrough
CT: control target
= control target key end

     0   :  { %6 = vsyncpa [#allocation3], 0  ;;  %s732_s6 = smov [#allocation2]   ;;  %s1502_s0 = inlined_call_operand.hbm [shape: f32[8,16,16], index: 0, kind: input, shape index: {}]   ;;  %s1503_s1 = inlined_call_operand.vmem [shape: f32[8,14,14], index: 1, kind: output, shape index: {}]  }
   0x1   :  { %s12_s7 = sshll.u32 %s732_s6, 4  ;;  %s708_s10 = scalar_lea.hbm %s1502_s0, 2048  ;;  %s13_s7 = int_to_ptr.vmem [resolvable:$true] %s12_s7 }
   0x2   :  { %p709_p0 = scmp.ne.s32.totalorder %s1502_s0, %s708_s10  ;;  %p712_p1 = scmp.lt.u32.totalorder %s708_s10, %s1502_s0 }
   0x4   :  { %p714_p2 = pnand %p712_p1, %p709_p0 }
   0x6   :  { %717 = shalt.err (!%p714_p2)
}
   0x7   :  { %s718_s15 = scalar_lea.vmem %s13_s7, 2048  ;;  %p723_p4 = scmp.lt.s32.totalorder %s13_s7, %s13_s7 }
   0x8   :  { %p719_p3 = scmp.ne.s32.totalorder %s13_s7, %s718_s15  ;;  %p724_p5 = scmp.lt.s32.totalorder %s718_s15, %s718_s15 }
   0xa   :  { %p725_p6 = por %p724_p5, %p723_p4 }
   0xc   :  { %p726_p7 = pnand %p725_p6, %p719_p3 }
   0xe   :  { %729 = shalt.err (!%p726_p7)
}
   0xf   :  { %s733_s16 = smov 128   ;;  %s734_s17 = smov 8  }
  0x10   :  { %18 = dma.hbm_to_vmem [thread:$0]  %s1502_s0, 2048, %s13_s7, [#allocation3], %s733_s16, %s733_s16, %s734_s17  }
  0x11   :  { %730 = dma.done.wait [#allocation3], 2048  }
  0x12   :  { %731 = vsyncadd [#allocation3], 4294965248  ;;  %v759_v0 = vld [vmem:[#allocation2 + $0x10] sm:$0xff]  ;;  %v761_v1 = vld [vmem:[#allocation2] sm:$0xff]  ;;  %s735_s20 = smov 127   ;;  %vm471_vm0 = vcmask 1045504  }
  0x13   :  { %v763_v2 = vld [vmem:[#allocation2 + $0x18] sm:$0xff]  ;;  %v766_v3 = vmul.f32 0.12210311, %v759_v0  ;;  %v769_v4 = vmul.f32 0.12210311, %v761_v1  ;;  %v771_v5 = vld [vmem:[#allocation2 + $0x8] sm:$0xff] }
  0x14   :  { %v778_v6 = vmul.f32 0.12210311, %v763_v2  ;;  %v781_v7 = vmul.f32 0.12210311, %v771_v5  ;;  %v783_v8 = vld [vmem:[#allocation2 + $0x28] sm:$0xff]  ;;  %v785_v9 = vld [vmem:[#allocation2 + $0x20] sm:$0xff] }
  0x15   :  { %90 = vrot.lane.b32.xlu1 %v766_v3, %s735_s20  ;;  %86 = vrot.lane.b32.xlu0 %v769_v4, %s735_s20  ;;  %v792_v10 = vmul.f32 0.12210311, %v783_v8  ;;  %v795_v11 = vmul.f32 0.12210311, %v785_v9  ;;  %v797_v12 = vld [vmem:[#allocation2 + $0x38] sm:$0xff]  ;;  %v799_v13 = vld [vmem:[#allocation2 + $0x30] sm:$0xff] }
  0x16   :  { %v806_v14 = vmul.f32 0.12210311, %v797_v12  ;;  %v809_v15 = vmul.f32 0.12210311, %v799_v13  ;;  %v811_v16 = vld [vmem:[#allocation2 + $0x48] sm:$0xff]  ;;  %v813_v17 = vld [vmem:[#allocation2 + $0x40] sm:$0xff] }
  0x17   :  { %v820_v18 = vmul.f32 0.12210311, %v811_v16  ;;  %v823_v19 = vmul.f32 0.12210311, %v813_v17  ;;  %v825_v20 = vld [vmem:[#allocation2 + $0x58] sm:$0xff]  ;;  %v827_v21 = vld [vmem:[#allocation2 + $0x50] sm:$0xff] }
  0x18   :  { %v834_v22 = vmul.f32 0.12210311, %v825_v20  ;;  %v837_v23 = vmul.f32 0.12210311, %v827_v21  ;;  %v839_v24 = vld [vmem:[#allocation2 + $0x68] sm:$0xff]  ;;  %v841_v25 = vld [vmem:[#allocation2 + $0x60] sm:$0xff] }
  0x19   :  { %92 = vrot.lane.b32.xlu1 %v778_v6, %s735_s20  ;;  %88 = vrot.lane.b32.xlu0 %v781_v7, %s735_s20  ;;  %v848_v26 = vmul.f32 0.12210311, %v839_v24  ;;  %v851_v27 = vmul.f32 0.12210311, %v841_v25  ;;  %v853_v28 = vld [vmem:[#allocation2 + $0x78] sm:$0xff]  ;;  %v855_v29 = vld [vmem:[#allocation2 + $0x70] sm:$0xff] }
  0x1a   :  { %v862_v30 = vmul.f32 0.12210311, %v853_v28  ;;  %v865_v31 = vmul.f32 0.12210311, %v855_v29  ;;  %v868_v32 = vmul.f32 0.044919223, %v761_v1 }
  0x1b   :  { %v1511_v33 = vrot.slane %v781_v7, 2  ;;  %v528_v34 = vrot.slane %v769_v4, 2  ;;  %v1510_v35 = vrot.slane %v778_v6, 2  ;;  %v874_v36 = vmul.f32 0.044919223, %v771_v5  ;;  %s736_s0 = smov 126  }
  0x1c   :  { %v531_v37 = vrot.slane %v766_v3, 2  ;;  %v1509_v38 = vrot.slane %v792_v10, 2  ;;  %v534_v39 = vrot.slane %v795_v11, 2  ;;  %v1508_v41 = vrot.slane %v806_v14, 2 }
  0x1d   :  { %96 = vrot.lane.b32.xlu1 %v792_v10, %s735_s20  ;;  %94 = vrot.lane.b32.xlu0 %v795_v11, %s735_s20  ;;  %v886_v40 = vsel %vm471_vm0, %v528_v34, %v1511_v33  ;;  %v537_v42 = vrot.slane %v809_v15, 2  ;;  %v1507_v43 = vrot.slane %v820_v18, 2  ;;  %v540_v46 = vrot.slane %v823_v19, 2 }
  0x1e   :  { %v894_v44 = vsel %vm471_vm0, %v531_v37, %v1510_v35  ;;  %v899_v45 = vsel %vm471_vm0, %v534_v39, %v1509_v38  ;;  %v1506_v47 = vrot.slane %v834_v22, 2  ;;  %v543_v49 = vrot.slane %v837_v23, 2 }
  0x1f   :  { %v906_v48 = vsel %vm471_vm0, %v537_v42, %v1508_v41  ;;  %v1505_v50 = vrot.slane %v848_v26, 2  ;;  %v546_v51 = vrot.slane %v851_v27, 2  ;;  %v914_v52 = vsel %vm471_vm0, %v540_v46, %v1507_v43 }
  0x20   :  { %v1504_v53 = vrot.slane %v862_v30, 2  ;;  %v549_v54 = vrot.slane %v865_v31, 2  ;;  %v923_v55 = vmul.f32 0.044919223, %v763_v2  ;;  %v926_v56 = vmul.f32 0.044919223, %v759_v0 }
  0x21   :  { %100 = vrot.lane.b32.xlu1 %v806_v14, %s735_s20  ;;  %98 = vrot.lane.b32.xlu0 %v809_v15, %s735_s20  ;;  %v931_v57 = vsel %vm471_vm0, %v543_v49, %v1506_v47  ;;  %v936_v58 = vsel %vm471_vm0, %v546_v51, %v1505_v50  ;;  %v948_v60 = vmul.f32 0.044919223, %v783_v8  ;;  %v951_v61 = vmul.f32 0.044919223, %v785_v9 }
  0x22   :  { %v941_v59 = vsel %vm471_vm0, %v549_v54, %v1504_v53  ;;  %v958_v62 = vmul.f32 0.044919223, %v797_v12  ;;  %v961_v63 = vmul.f32 0.044919223, %v799_v13  ;;  %v968_v34 = vmul.f32 0.044919223, %v811_v16 }
  0x23   :  { %v971_v37 = vmul.f32 0.044919223, %v813_v17  ;;  %v978_v39 = vmul.f32 0.044919223, %v825_v20  ;;  %v981_v42 = vmul.f32 0.044919223, %v827_v21 }
  0x24   :  { %v988_v46 = vmul.f32 0.044919223, %v839_v24  ;;  %v991_v49 = vmul.f32 0.044919223, %v841_v25  ;;  %v288_v51 = vmul.f32 0.3319107, %v771_v5 }
  0x25   :  { %104 = vrot.lane.b32.xlu1 %v820_v18, %s735_s20  ;;  %102 = vrot.lane.b32.xlu0 %v823_v19, %s735_s20  ;;  %v287_v54 = vmul.f32 0.3319107, %v761_v1  ;;  %v1000_v53 = vmul.f32 0.044919223, %v853_v28  ;;  %v1003_v50 = vmul.f32 0.044919223, %v855_v29 }
  0x26   :  { %v320_v47 = vrot.slane %v288_v51, 1  ;;  %v290_v41 = vmul.f32 0.3319107, %v763_v2  ;;  %v289_v5 = vmul.f32 0.3319107, %v759_v0  ;;  %vm230_vm1 = vcmask 1046528  }
  0x27   :  { %1516 = vst [vmem:[#allocation5_spill] sm:$0xff] %v1000_v53  ;;  %1517 = vst [vmem:[#allocation6_spill] sm:$0xff] %v1003_v50  ;;  %v319_v43 = vrot.slane %v287_v54, 1  ;;  %v292_v1 = vmul.f32 0.3319107, %v783_v8  ;;  %vm682_vm2 = vcmask 111616  }
  0x28   :  { %v323_v35 = vrot.slane %v290_v41, 1  ;;  %v322_v33 = vrot.slane %v289_v5, 1  ;;  %v291_v51 = vmul.f32 0.3319107, %v785_v9  ;;  %v294_v0 = vmul.f32 0.3319107, %v797_v12 }
  0x29   :  { %108 = vrot.lane.b32.xlu1 %v834_v22, %s735_s20  ;;  %106 = vrot.lane.b32.xlu0 %v837_v23, %s735_s20  ;;  %v321_v38 = vsel %vm230_vm1, %v319_v43, %v320_v47  ;;  %v326_v54 = vrot.slane %v292_v1, 1  ;;  %v296_v8 = vmul.f32 0.3319107, %v811_v16  ;;  %v300_v16 = vmul.f32 0.3319107, %v839_v24 }
  0x2a   :  { %v324_v2 = vsel %vm230_vm1, %v322_v33, %v323_v35  ;;  %v329_v41 = vrot.slane %v294_v0, 1  ;;  %v299_v5 = vmul.f32 0.3319107, %v841_v25  ;;  %v301_v0 = vmul.f32 0.3319107, %v855_v29 }
  0x2b   :  { %v332_v12 = vrot.slane %v296_v8, 1  ;;  %v338_v1 = vrot.slane %v300_v16, 1  ;;  %v231_v8 = vrot.slane %v769_v4, 1  ;;  %v246_v16 = vrot.slane %v837_v23, 1 }
  0x2c   :  { %v340_v25 = vrot.slane %v301_v0, 1  ;;  %vm680_vm3 = vcmask 113664  }
  0x2d   :  { %112 = vrot.lane.b32.xlu1 %v848_v26, %s735_s20  ;;  %110 = vrot.lane.b32.xlu0 %v851_v27, %s735_s20 }
  0x31   :  { %116 = vrot.lane.b32.xlu1 %v862_v30, %s735_s20  ;;  %114 = vrot.lane.b32.xlu0 %v865_v31, %s735_s20 }
  0x35   :  { %168 = vrot.lane.b32.xlu1 %v874_v36, %s736_s0  ;;  %166 = vrot.lane.b32.xlu0 %v868_v32, %s736_s0 }
  0x39   :  { %172 = vrot.lane.b32.xlu1 %v923_v55, %s736_s0  ;;  %170 = vrot.lane.b32.xlu0 %v926_v56, %s736_s0 }
  0x3d   :  { %176 = vrot.lane.b32.xlu1 %v948_v60, %s736_s0  ;;  %174 = vrot.lane.b32.xlu0 %v951_v61, %s736_s0 }
  0x41   :  { %180 = vrot.lane.b32.xlu1 %v958_v62, %s736_s0  ;;  %178 = vrot.lane.b32.xlu0 %v961_v63, %s736_s0 }
  0x45   :  { %184 = vrot.lane.b32.xlu1 %v968_v34, %s736_s0  ;;  %182 = vrot.lane.b32.xlu0 %v971_v37, %s736_s0 }
  0x49   :  { %188 = vrot.lane.b32.xlu1 %v978_v39, %s736_s0  ;;  %186 = vrot.lane.b32.xlu0 %v981_v42, %s736_s0 }
  0x4d   :  { %192 = vrot.lane.b32.xlu1 %v988_v46, %s736_s0  ;;  %190 = vrot.lane.b32.xlu0 %v991_v49, %s736_s0 }
  0x51   :  { %196 = vrot.lane.b32.xlu1 %v1000_v53, %s736_s0  ;;  %194 = vrot.lane.b32.xlu0 %v1003_v50, %s736_s0  ;;  %v325_v53 = vrot.slane %v291_v51, 1  ;;  %v293_v50 = vmul.f32 0.3319107, %v799_v13  ;;  %v337_v51 = vrot.slane %v299_v5, 1 }
  0x53   :  { %v327_v9 = vsel %vm230_vm1, %v325_v53, %v326_v54  ;;  %v328_v43 = vrot.slane %v293_v50, 1  ;;  %v339_v24 = vsel %vm230_vm1, %v337_v51, %v338_v1 }
  0x55   :  { %345 = vrot.lane.b32.xlu1 %v320_v47, %s735_s20  ;;  %343 = vrot.lane.b32.xlu0 %v321_v38, %s735_s20  ;;  %v295_v38 = vmul.f32 0.3319107, %v813_v17  ;;  %v330_v33 = vsel %vm230_vm1, %v328_v43, %v329_v41  ;;  %v297_v47 = vmul.f32 0.3319107, %v827_v21  ;;  %v1068_v43 = vrot.slane %v792_v10, 1 }
  0x57   :  { %v331_v13 = vrot.slane %v295_v38, 1  ;;  %v334_v53 = vrot.slane %v297_v47, 1  ;;  %v237_v38 = vrot.slane %v795_v11, 1  ;;  %v1104_v47 = vrot.slane %v834_v22, 1 }
  0x59   :  { %349 = vrot.lane.b32.xlu1 %v323_v35, %s735_s20  ;;  %347 = vrot.lane.b32.xlu0 %v324_v2, %s735_s20  ;;  %v298_v35 = vmul.f32 0.3319107, %v825_v20  ;;  %v333_v17 = vsel %vm230_vm1, %v331_v13, %v332_v12  ;;  %v302_v20 = vmul.f32 0.3319107, %v853_v28  ;;  %v1092_v13 = vrot.slane %v820_v18, 1 }
  0x5b   :  { %v335_v50 = vrot.slane %v298_v35, 1  ;;  %v341_v2 = vrot.slane %v302_v20, 1  ;;  %v243_v35 = vrot.slane %v823_v19, 1  ;;  %v1113_v19 = vsel %vm230_vm1, %v246_v16, %v1104_v47 }
  0x5c   :  { %v1128_v20 = vrot.slane %v862_v30, 1 }
  0x5d   :  { %353 = vrot.lane.b32.xlu1 %v326_v54, %s735_s20  ;;  %351 = vrot.lane.b32.xlu0 %v327_v9, %s735_s20  ;;  %v336_v21 = vsel %vm230_vm1, %v334_v53, %v335_v50  ;;  %v342_v28 = vsel %vm230_vm1, %v340_v25, %v341_v2  ;;  %v1046_v54 = vrot.slane %v781_v7, 1  ;;  %v1056_v9 = vrot.slane %v778_v6, 1 }
  0x5e   :  { %v1518_v25 = vrot.slane %v781_v7, 2  ;;  %v1520_v7 = vrot.slane %v792_v10, 2  ;;  %v1522_v10 = vrot.slane %v820_v18, 2 }
  0x5f   :  { %v1053_v29 = vsel %vm230_vm1, %v231_v8, %v1046_v54 }
  0x61   :  { %357 = vrot.lane.b32.xlu1 %v329_v41, %s735_s20  ;;  %355 = vrot.lane.b32.xlu0 %v330_v33, %s735_s20  ;;  %v234_v41 = vrot.slane %v766_v3, 1  ;;  %v1077_v3 = vsel %vm230_vm1, %v237_v38, %v1068_v43  ;;  %v240_v33 = vrot.slane %v809_v15, 1  ;;  %v1101_v15 = vsel %vm230_vm1, %v243_v35, %v1092_v13 }
  0x63   :  { %v1065_v4 = vsel %vm230_vm1, %v234_v41, %v1056_v9  ;;  %v1519_v41 = vrot.slane %v778_v6, 2  ;;  %v1521_v6 = vrot.slane %v806_v14, 2 }
  0x65   :  { %361 = vrot.lane.b32.xlu1 %v332_v12, %s735_s20  ;;  %359 = vrot.lane.b32.xlu0 %v333_v17, %s735_s20  ;;  %v1080_v12 = vrot.slane %v806_v14, 1  ;;  %v1116_v17 = vrot.slane %v848_v26, 1 }
  0x67   :  { %v1089_v11 = vsel %vm230_vm1, %v240_v33, %v1080_v12 }
  0x69   :  { %365 = vrot.lane.b32.xlu1 %v335_v50, %s735_s20  ;;  %363 = vrot.lane.b32.xlu0 %v336_v21, %s735_s20  ;;  %v249_v50 = vrot.slane %v851_v27, 1  ;;  %v252_v21 = vrot.slane %v865_v31, 1 }
  0x6b   :  { %v1125_v23 = vsel %vm230_vm1, %v249_v50, %v1116_v17  ;;  %v1137_v27 = vsel %vm230_vm1, %v252_v21, %v1128_v20 }
  0x6d   :  { %369 = vrot.lane.b32.xlu1 %v338_v1, %s735_s20  ;;  %367 = vrot.lane.b32.xlu0 %v339_v24, %s735_s20 }
  0x71   :  { %373 = vrot.lane.b32.xlu1 %v341_v2, %s735_s20  ;;  %371 = vrot.lane.b32.xlu0 %v342_v28, %s735_s20 }
  0x75   :  { %409 = vrot.lane.b32.xlu1 %v1046_v54, %s736_s0  ;;  %407 = vrot.lane.b32.xlu0 %v1053_v29, %s736_s0 }
  0x79   :  { %413 = vrot.lane.b32.xlu1 %v1056_v9, %s736_s0  ;;  %411 = vrot.lane.b32.xlu0 %v1065_v4, %s736_s0 }
  0x7d   :  { %417 = vrot.lane.b32.xlu1 %v1068_v43, %s736_s0  ;;  %415 = vrot.lane.b32.xlu0 %v1077_v3, %s736_s0 }
  0x81   :  { %421 = vrot.lane.b32.xlu1 %v1080_v12, %s736_s0  ;;  %419 = vrot.lane.b32.xlu0 %v1089_v11, %s736_s0 }
  0x85   :  { %425 = vrot.lane.b32.xlu1 %v1092_v13, %s736_s0  ;;  %423 = vrot.lane.b32.xlu0 %v1101_v15, %s736_s0 }
  0x87   :  { %v91_v53 = vpop.permute.xlu1 %90  ;;  %v87_v5 = vpop.permute.xlu0 %86 }
  0x88   :  { %v136_v18 = vadd.f32 %v91_v53, %v926_v56  ;;  %v472_v53 = vrot.slane %v868_v32, 2 }
  0x89   :  { %429 = vrot.lane.b32.xlu1 %v1104_v47, %s736_s0  ;;  %427 = vrot.lane.b32.xlu0 %v1113_v19, %s736_s0 }
  0x8b   :  { %v93_v1 = vpop.permute.xlu1 %92  ;;  %v89_v51 = vpop.permute.xlu0 %88 }
  0x8c   :  { %v135_v50 = vadd.f32 %v89_v51, %v874_v36 }
  0x8d   :  { %433 = vrot.lane.b32.xlu1 %v1116_v17, %s736_s0  ;;  %431 = vrot.lane.b32.xlu0 %v1125_v23, %s736_s0 }
  0x8f   :  { %v97_v0 = vpop.permute.xlu1 %96  ;;  %v95_v24 = vpop.permute.xlu0 %94 }
  0x91   :  { %437 = vrot.lane.b32.xlu1 %v1128_v20, %s736_s0  ;;  %435 = vrot.lane.b32.xlu0 %v1137_v27, %s736_s0 }
  0x93   :  { %v101_v31 = vpop.permute.xlu1 %100  ;;  %v99_v2 = vpop.permute.xlu0 %98 }
  0x95   :  { %554 = vrot.lane.b32.xlu1 %v1518_v25, %s735_s20  ;;  %552 = vrot.lane.b32.xlu0 %v886_v40, %s735_s20 }
  0x97   :  { %v105_v28 = vpop.permute.xlu1 %104  ;;  %v103_v8 = vpop.permute.xlu0 %102 }
  0x99   :  { %558 = vrot.lane.b32.xlu1 %v1519_v41, %s735_s20  ;;  %556 = vrot.lane.b32.xlu0 %v894_v44, %s735_s20  ;;  %v1523_v41 = vrot.slane %v834_v22, 2  ;;  %v1202_v22 = vrot.slane %v874_v36, 2  ;;  %v1218_v36 = vrot.slane %v923_v55, 2 }
  0x9b   :  { %v1153_v38 = vpop.permute.xlu1 %108  ;;  %v1155_v33 = vpop.permute.xlu0 %106 }
  0x9d   :  { %562 = vrot.lane.b32.xlu1 %v1520_v7, %s735_s20  ;;  %560 = vrot.lane.b32.xlu0 %v899_v45, %s735_s20  ;;  %v134_v45 = vadd.f32 %v87_v5, %v868_v32  ;;  %v475_v32 = vrot.slane %v926_v56, 2  ;;  %v1241_v56 = vrot.slane %v948_v60, 2 }
  0x9f   :  { %v1162_v40 = vpop.permute.xlu1 %112  ;;  %v1164_v35 = vpop.permute.xlu0 %110 }
  0xa1   :  { %566 = vrot.lane.b32.xlu1 %v1521_v6, %s735_s20  ;;  %564 = vrot.lane.b32.xlu0 %v906_v48, %s735_s20 }
  0xa3   :  { %v1171_v44 = vpop.permute.xlu1 %116  ;;  %v1173_v16 = vpop.permute.xlu0 %114 }
  0xa5   :  { %570 = vrot.lane.b32.xlu1 %v1522_v10, %s735_s20  ;;  %568 = vrot.lane.b32.xlu0 %v914_v52, %s735_s20  ;;  %v137_v52 = vadd.f32 %v93_v1, %v923_v55  ;;  %v1238_v55 = vsel %vm471_vm0, %v475_v32, %v1218_v36 }
  0xa7   :  { %v169_v14 = vpop.permute.xlu1 %168  ;;  %v167_v21 = vpop.permute.xlu0 %166 }
  0xa8   :  { %v1182_v25 = vadd.f32 %v169_v14, %v135_v50  ;;  %v214_v48 = vadd.f32 %v167_v21, %v134_v45  ;;  %v1524_v45 = vrot.slane %v848_v26, 2 }
  0xa9   :  { %574 = vrot.lane.b32.xlu1 %v1523_v41, %s735_s20  ;;  %572 = vrot.lane.b32.xlu0 %v931_v57, %s735_s20  ;;  %v139_v57 = vadd.f32 %v97_v0, %v948_v60  ;;  %v140_v0 = vadd.f32 %v99_v2, %v961_v63  ;;  %v478_v2 = vrot.slane %v951_v61, 2  ;;  %v1256_v60 = vrot.slane %v958_v62, 2 }
  0xaa   :  { %v1192_v5 = vadd.f32 %v1053_v29, %v214_v48  ;;  %v138_v29 = vadd.f32 %v95_v24, %v951_v61  ;;  %v1225_v24 = vsel %vm471_vm0, %v472_v53, %v1202_v22  ;;  %v145_v61 = vadd.f32 %v1153_v38, %v978_v39 }
  0xab   :  { %v173_v51 = vpop.permute.xlu1 %172  ;;  %v171_v7 = vpop.permute.xlu0 %170  ;;  %v1281_v38 = vrot.slane %v968_v34, 2 }
  0xac   :  { %v1194_v6 = vadd.f32 %v173_v51, %v137_v52  ;;  %v216_v10 = vadd.f32 %v171_v7, %v136_v18 }
  0xad   :  { %578 = vrot.lane.b32.xlu1 %v1524_v45, %s735_s20  ;;  %576 = vrot.lane.b32.xlu0 %v936_v58, %s735_s20  ;;  %v1525_v58 = vrot.slane %v862_v30, 2 }
  0xae   :  { %v1208_v1 = vadd.f32 %v1065_v4, %v216_v10  ;;  %v141_v4 = vadd.f32 %v101_v31, %v958_v62  ;;  %v142_v31 = vadd.f32 %v103_v8, %v971_v37  ;;  %v1265_v8 = vsel %vm471_vm0, %v478_v2, %v1241_v56 }
  0xaf   :  { %v177_v50 = vpop.permute.xlu1 %176  ;;  %v175_v14 = vpop.permute.xlu0 %174 }
  0xb0   :  { %v1210_v21 = vadd.f32 %v177_v50, %v139_v57  ;;  %v218_v26 = vadd.f32 %v175_v14, %v138_v29  ;;  %v484_v14 = vrot.slane %v971_v37, 2 }
  0xb1   :  { %582 = vrot.lane.b32.xlu1 %v1525_v58, %s735_s20  ;;  %580 = vrot.lane.b32.xlu0 %v941_v59, %s735_s20 }
  0xb2   :  { %v1228_v48 = vadd.f32 %v1077_v3, %v218_v26  ;;  %v143_v3 = vadd.f32 %v105_v28, %v968_v34  ;;  %v481_v28 = vrot.slane %v961_v63, 2  ;;  %v1294_v34 = vrot.slane %v978_v39, 2 }
  0xb3   :  { %v181_v30 = vpop.permute.xlu1 %180  ;;  %v179_v41 = vpop.permute.xlu0 %178 }
  0xb4   :  { %v1230_v18 = vadd.f32 %v181_v30, %v141_v4  ;;  %v220_v59 = vadd.f32 %v179_v41, %v140_v0  ;;  %v1278_v63 = vsel %vm471_vm0, %v481_v28, %v1256_v60  ;;  %v1527_v30 = vld [vmem:[#allocation6_spill] sm:$0xff]  ;;  %v1303_v41 = vsel %vm471_vm0, %v484_v14, %v1281_v38 }
  0xb5   :  { %618 = vrot.lane.b32.xlu1 %v1202_v22, %s736_s0  ;;  %616 = vrot.lane.b32.xlu0 %v1225_v24, %s736_s0 }
  0xb6   :  { %v1247_v52 = vadd.f32 %v1089_v11, %v220_v59  ;;  %v144_v11 = vadd.f32 %v1155_v33, %v981_v42  ;;  %v146_v33 = vadd.f32 %v1164_v35, %v991_v49  ;;  %v1526_v35 = vld [vmem:[#allocation5_spill] sm:$0xff] }
  0xb7   :  { %v185_v51 = vpop.permute.xlu1 %184  ;;  %v183_v7 = vpop.permute.xlu0 %182  ;;  %v149_v37 = vadd.f32 %v1171_v44, %v1526_v35  ;;  %v1317_v44 = vrot.slane %v988_v46, 2 }
  0xb8   :  { %v1249_v10 = vadd.f32 %v185_v51, %v143_v3  ;;  %v222_v45 = vadd.f32 %v183_v7, %v142_v31 }
  0xb9   :  { %622 = vrot.lane.b32.xlu1 %v1218_v36, %s736_s0  ;;  %620 = vrot.lane.b32.xlu0 %v1238_v55, %s736_s0 }
  0xba   :  { %v1268_v57 = vadd.f32 %v1101_v15, %v222_v45  ;;  %v147_v15 = vadd.f32 %v1162_v40, %v988_v46  ;;  %v487_v40 = vrot.slane %v981_v42, 2  ;;  %v272_v42 = vadd.f32 %v1046_v54, %v1182_v25 }
  0xbb   :  { %v189_v29 = vpop.permute.xlu1 %188  ;;  %v187_v53 = vpop.permute.xlu0 %186  ;;  %v274_v46 = vadd.f32 %v1056_v9, %v1194_v6  ;;  %v1335_v54 = vrot.slane %v1526_v35, 2  ;;  %v276_v9 = vadd.f32 %v1068_v43, %v1210_v21 }
  0xbc   :  { %v1270_v50 = vadd.f32 %v189_v29, %v145_v61  ;;  %v224_v62 = vadd.f32 %v187_v53, %v144_v11  ;;  %v1312_v39 = vsel %vm471_vm0, %v487_v40, %v1294_v34 }
  0xbd   :  { %626 = vrot.lane.b32.xlu1 %v1241_v56, %s736_s0  ;;  %624 = vrot.lane.b32.xlu0 %v1265_v8, %s736_s0 }
  0xbe   :  { %v281_v26 = vadd.f32 %v1113_v19, %v224_v62  ;;  %v148_v19 = vadd.f32 %v1173_v16, %v1527_v30 }
  0xbf   :  { %v193_v58 = vpop.permute.xlu1 %192  ;;  %v191_v32 = vpop.permute.xlu0 %190 }
  0xc0   :  { %v227_v4 = vadd.f32 %v193_v58, %v147_v15  ;;  %v226_v0 = vadd.f32 %v191_v32, %v146_v33  ;;  %v280_v32 = vadd.f32 %v1092_v13, %v1249_v10 }
  0xc1   :  { %630 = vrot.lane.b32.xlu1 %v1256_v60, %s736_s0  ;;  %628 = vrot.lane.b32.xlu0 %v1278_v63, %s736_s0 }
  0xc2   :  { %v283_v59 = vadd.f32 %v1125_v23, %v226_v0  ;;  %v490_v23 = vrot.slane %v991_v49, 2 }
  0xc3   :  { %v197_v3 = vpop.permute.xlu1 %196  ;;  %v195_v31 = vpop.permute.xlu0 %194 }
  0xc4   :  { %v229_v2 = vadd.f32 %v197_v3, %v149_v37  ;;  %v228_v51 = vadd.f32 %v195_v31, %v148_v19  ;;  %v1332_v49 = vsel %vm471_vm0, %v490_v23, %v1317_v44  ;;  %v282_v37 = vadd.f32 %v1104_v47, %v1270_v50 }
  0xc5   :  { %634 = vrot.lane.b32.xlu1 %v1281_v38, %s736_s0  ;;  %632 = vrot.lane.b32.xlu0 %v1303_v41, %s736_s0  ;;  %v284_v3 = vadd.f32 %v1116_v17, %v227_v4 }
  0xc6   :  { %v285_v16 = vadd.f32 %v1137_v27, %v228_v51  ;;  %v493_v27 = vrot.slane %v1527_v30, 2  ;;  %v286_v10 = vadd.f32 %v1128_v20, %v229_v2 }
  0xc7   :  { %v346_v7 = vpop.permute.xlu1 %345  ;;  %v344_v45 = vpop.permute.xlu0 %343 }
  0xc8   :  { %v1321_v28 = vadd.f32 %v346_v7, %v272_v42  ;;  %v391_v61 = vadd.f32 %v344_v45, %v1192_v5  ;;  %v1349_v6 = vsel %vm471_vm0, %v493_v27, %v1335_v54 }
  0xc9   :  { %638 = vrot.lane.b32.xlu1 %v1294_v34, %s736_s0  ;;  %636 = vrot.lane.b32.xlu0 %v1312_v39, %s736_s0 }
  0xcb   :  { %v350_v25 = vpop.permute.xlu1 %349  ;;  %v348_v5 = vpop.permute.xlu0 %347 }
  0xcc   :  { %v1338_v11 = vadd.f32 %v350_v25, %v274_v46  ;;  %v393_v29 = vadd.f32 %v348_v5, %v1208_v1  ;;  %v278_v1 = vadd.f32 %v1080_v12, %v1230_v18 }
  0xcd   :  { %642 = vrot.lane.b32.xlu1 %v1317_v44, %s736_s0  ;;  %640 = vrot.lane.b32.xlu0 %v1332_v49, %s736_s0 }
  0xcf   :  { %v354_v53 = vpop.permute.xlu1 %353  ;;  %v352_v62 = vpop.permute.xlu0 %351 }
  0xd0   :  { %v1351_v15 = vadd.f32 %v354_v53, %v276_v9  ;;  %v395_v33 = vadd.f32 %v352_v62, %v1228_v48 }
  0xd1   :  { %646 = vrot.lane.b32.xlu1 %v1335_v54, %s736_s0  ;;  %644 = vrot.lane.b32.xlu0 %v1349_v6, %s736_s0 }
  0xd3   :  { %v358_v43 = vpop.permute.xlu1 %357  ;;  %v356_v21 = vpop.permute.xlu0 %355 }
  0xd4   :  { %v1360_v14 = vadd.f32 %v358_v43, %v278_v1  ;;  %v397_v58 = vadd.f32 %v356_v21, %v1247_v52 }
  0xd7   :  { %v362_v0 = vpop.permute.xlu1 %361  ;;  %v360_v48 = vpop.permute.xlu0 %359 }
  0xd8   :  { %v1365_v40 = vadd.f32 %v362_v0, %v280_v32  ;;  %v399_v35 = vadd.f32 %v360_v48, %v1268_v57 }
  0xdb   :  { %v366_v30 = vpop.permute.xlu1 %365  ;;  %v364_v12 = vpop.permute.xlu0 %363 }
  0xdc   :  { %v1370_v18 = vadd.f32 %v366_v30, %v282_v37  ;;  %v401_v19 = vadd.f32 %v364_v12, %v281_v26 }
  0xdf   :  { %v370_v52 = vpop.permute.xlu1 %369  ;;  %v368_v31 = vpop.permute.xlu0 %367 }
  0xe0   :  { %v1373_v51 = vadd.f32 %v370_v52, %v284_v3  ;;  %v403_v13 = vadd.f32 %v368_v31, %v283_v59 }
  0xe3   :  { %v374_v42 = vpop.permute.xlu1 %373  ;;  %v372_v23 = vpop.permute.xlu0 %371 }
  0xe4   :  { %v1376_v57 = vadd.f32 %v374_v42, %v286_v10  ;;  %v405_v7 = vadd.f32 %v372_v23, %v285_v16 }
  0xe7   :  { %v410_v47 = vpop.permute.xlu1 %409  ;;  %v408_v50 = vpop.permute.xlu0 %407 }
  0xe8   :  { %v455_v45 = vadd.f32 %v408_v50, %v391_v61 }
  0xea   :  { %v512_v46 = vadd.f32 %v1225_v24, %v455_v45 }
  0xeb   :  { %v414_v26 = vpop.permute.xlu1 %413  ;;  %v412_v27 = vpop.permute.xlu0 %411 }
  0xec   :  { %v457_v17 = vadd.f32 %v412_v27, %v393_v29  ;;  %v458_v45 = vadd.f32 %v414_v26, %v1338_v11 }
  0xee   :  { %v514_v4 = vadd.f32 %v1238_v55, %v457_v17 }
  0xef   :  { %v418_v25 = vpop.permute.xlu1 %417  ;;  %v416_v5 = vpop.permute.xlu0 %415 }
  0xf0   :  { %v459_v59 = vadd.f32 %v416_v5, %v395_v33 }
  0xf2   :  { %v516_v20 = vadd.f32 %v1265_v8, %v459_v59 }
  0xf3   :  { %v422_v2 = vpop.permute.xlu1 %421  ;;  %v420_v9 = vpop.permute.xlu0 %419 }
  0xf4   :  { %v461_v53 = vadd.f32 %v420_v9, %v397_v58 }
  0xf6   :  { %v1382_v16 = vadd.f32 %v1278_v63, %v461_v53  ;;  %v460_v53 = vadd.f32 %v418_v25, %v1351_v15  ;;  %v462_v15 = vadd.f32 %v422_v2, %v1360_v14 }
  0xf7   :  { %v426_v62 = vpop.permute.xlu1 %425  ;;  %v424_v61 = vpop.permute.xlu0 %423 }
  0xf8   :  { %v463_v1 = vadd.f32 %v424_v61, %v399_v35  ;;  %v515_v61 = vadd.f32 %v1218_v36, %v458_v45  ;;  %v517_v36 = vadd.f32 %v1241_v56, %v460_v53  ;;  %v464_v14 = vadd.f32 %v426_v62, %v1365_v40 }
  0xf9   :  { %v519_v56 = vadd.f32 %v1256_v60, %v462_v15 }
  0xfa   :  { %v1385_v24 = vadd.f32 %v1303_v41, %v463_v1  ;;  %v521_v40 = vadd.f32 %v1281_v38, %v464_v14 }
  0xfb   :  { %v1387_v29 = vpop.permute.xlu1 %429  ;;  %v428_v55 = vpop.permute.xlu0 %427 }
  0xfc   :  { %v465_v43 = vadd.f32 %v428_v55, %v401_v19  ;;  %v466_v60 = vadd.f32 %v1387_v29, %v1370_v18 }
  0xfe   :  { %v1390_v33 = vadd.f32 %v1312_v39, %v465_v43  ;;  %v523_v18 = vadd.f32 %v1294_v34, %v466_v60 }
  0xff   :  { %v1392_v8 = vpop.permute.xlu1 %433  ;;  %v432_v21 = vpop.permute.xlu0 %431 }
 0x100   :  { %v467_v58 = vadd.f32 %v432_v21, %v403_v13  ;;  %v468_v38 = vadd.f32 %v1392_v8, %v1373_v51 }
 0x102   :  { %v1395_v63 = vadd.f32 %v1332_v49, %v467_v58  ;;  %v525_v51 = vadd.f32 %v1317_v44, %v468_v38 }
 0x103   :  { %v1397_v32 = vpop.permute.xlu1 %437  ;;  %v436_v0 = vpop.permute.xlu0 %435 }
 0x104   :  { %v469_v48 = vadd.f32 %v436_v0, %v405_v7  ;;  %v456_v7 = vadd.f32 %v410_v47, %v1321_v28  ;;  %v470_v34 = vadd.f32 %v1397_v32, %v1376_v57 }
 0x106   :  { %v1400_v41 = vadd.f32 %v1349_v6, %v469_v48  ;;  %v513_v27 = vadd.f32 %v1202_v22, %v456_v7  ;;  %v527_v44 = vadd.f32 %v1335_v54, %v470_v34 }
 0x107   :  { %v555_v35 = vpop.permute.xlu1 %554  ;;  %v553_v37 = vpop.permute.xlu0 %552 }
 0x108   :  { %v601_v17 = vadd.f32 %v555_v35, %v513_v27  ;;  %v600_v5 = vadd.f32 %v553_v37, %v512_v46 }
 0x10b   :  { %v559_v30 = vpop.permute.xlu1 %558  ;;  %v557_v12 = vpop.permute.xlu0 %556 }
 0x10c   :  { %v603_v47 = vadd.f32 %v559_v30, %v515_v61  ;;  %v602_v55 = vadd.f32 %v557_v12, %v514_v4 }
 0x10f   :  { %v563_v39 = vpop.permute.xlu1 %562  ;;  %v561_v19 = vpop.permute.xlu0 %560 }
 0x110   :  { %v605_v25 = vadd.f32 %v563_v39, %v517_v36  ;;  %v604_v4 = vadd.f32 %v561_v19, %v516_v20 }
 0x113   :  { %v567_v3 = vpop.permute.xlu1 %566  ;;  %v565_v52 = vpop.permute.xlu0 %564 }
 0x114   :  { %v607_v0 = vadd.f32 %v567_v3, %v519_v56  ;;  %v606_v20 = vadd.f32 %v565_v52, %v1382_v16 }
 0x117   :  { %v571_v31 = vpop.permute.xlu1 %570  ;;  %v569_v13 = vpop.permute.xlu0 %568 }
 0x118   :  { %v609_v16 = vadd.f32 %v571_v31, %v521_v40  ;;  %v608_v30 = vadd.f32 %v569_v13, %v1385_v24 }
 0x11b   :  { %v575_v10 = vpop.permute.xlu1 %574  ;;  %v573_v49 = vpop.permute.xlu0 %572 }
 0x11c   :  { %v611_v24 = vadd.f32 %v575_v10, %v523_v18  ;;  %v610_v3 = vadd.f32 %v573_v49, %v1390_v33 }
 0x11f   :  { %v1402_v42 = vpop.permute.xlu1 %578  ;;  %v1404_v23 = vpop.permute.xlu0 %576 }
 0x120   :  { %v613_v33 = vadd.f32 %v1402_v42, %v525_v51  ;;  %v612_v10 = vadd.f32 %v1404_v23, %v1395_v63 }
 0x123   :  { %v1407_v6 = vpop.permute.xlu1 %582  ;;  %v1409_v50 = vpop.permute.xlu0 %580 }
 0x124   :  { %v615_v42 = vadd.f32 %v1407_v6, %v527_v44  ;;  %v614_v63 = vadd.f32 %v1409_v50, %v1400_v41 }
 0x127   :  { %v619_v59 = vpop.permute.xlu1 %618  ;;  %v617_v9 = vpop.permute.xlu0 %616 }
 0x128   :  { %v665_v1 = vadd.f32 %v619_v59, %v601_v17  ;;  %v664_v28 = vadd.f32 %v617_v9, %v600_v5 }
 0x12a   :  { %683 = vst.msk [vmem:[%s1503_s1 + $0x8] sm:$0x3f] %vm682_vm2, %v665_v1 }
 0x12b   :  { %681 = vst.msk [vmem:[%s1503_s1] sm:$0xff] %vm680_vm3, %v664_v28  ;;  %v623_v22 = vpop.permute.xlu1 %622  ;;  %v621_v11 = vpop.permute.xlu0 %620 }
 0x12c   :  { %v667_v46 = vadd.f32 %v623_v22, %v603_v47  ;;  %v666_v26 = vadd.f32 %v621_v11, %v602_v55 }
 0x12e   :  { %685 = vst.msk [vmem:[%s1503_s1 + $0x18] sm:$0x3f] %vm682_vm2, %v667_v46 }
 0x12f   :  { %684 = vst.msk [vmem:[%s1503_s1 + $0x10] sm:$0xff] %vm680_vm3, %v666_v26  ;;  %v627_v43 = vpop.permute.xlu1 %626  ;;  %v625_v21 = vpop.permute.xlu0 %624 }
 0x130   :  { %v669_v2 = vadd.f32 %v627_v43, %v605_v25  ;;  %v668_v58 = vadd.f32 %v625_v21, %v604_v4 }
 0x132   :  { %687 = vst.msk [vmem:[%s1503_s1 + $0x28] sm:$0x3f] %vm682_vm2, %v669_v2 }
 0x133   :  { %686 = vst.msk [vmem:[%s1503_s1 + $0x20] sm:$0xff] %vm680_vm3, %v668_v58  ;;  %v631_v48 = vpop.permute.xlu1 %630  ;;  %v629_v35 = vpop.permute.xlu0 %628 }
 0x134   :  { %v671_v62 = vadd.f32 %v631_v48, %v607_v0  ;;  %v670_v37 = vadd.f32 %v629_v35, %v606_v20 }
 0x136   :  { %689 = vst.msk [vmem:[%s1503_s1 + $0x38] sm:$0x3f] %vm682_vm2, %v671_v62 }
 0x137   :  { %688 = vst.msk [vmem:[%s1503_s1 + $0x30] sm:$0xff] %vm680_vm3, %v670_v37  ;;  %v635_v12 = vpop.permute.xlu1 %634  ;;  %v633_v39 = vpop.permute.xlu0 %632 }
 0x138   :  { %v673_v29 = vadd.f32 %v635_v12, %v609_v16  ;;  %v672_v19 = vadd.f32 %v633_v39, %v608_v30 }
 0x13a   :  { %691 = vst.msk [vmem:[%s1503_s1 + $0x48] sm:$0x3f] %vm682_vm2, %v673_v29 }
 0x13b   :  { %690 = vst.msk [vmem:[%s1503_s1 + $0x40] sm:$0xff] %vm680_vm3, %v672_v19  ;;  %v639_v52 = vpop.permute.xlu1 %638  ;;  %v637_v31 = vpop.permute.xlu0 %636 }
 0x13c   :  { %v675_v8 = vadd.f32 %v639_v52, %v611_v24  ;;  %v674_v13 = vadd.f32 %v637_v31, %v610_v3 }
 0x13e   :  { %693 = vst.msk [vmem:[%s1503_s1 + $0x58] sm:$0x3f] %vm682_vm2, %v675_v8 }
 0x13f   :  { %692 = vst.msk [vmem:[%s1503_s1 + $0x50] sm:$0xff] %vm680_vm3, %v674_v13  ;;  %v643_v57 = vpop.permute.xlu1 %642  ;;  %v641_v32 = vpop.permute.xlu0 %640 }
 0x140   :  { %v677_v49 = vadd.f32 %v643_v57, %v613_v33  ;;  %v676_v7 = vadd.f32 %v641_v32, %v612_v10 }
 0x142   :  { %695 = vst.msk [vmem:[%s1503_s1 + $0x68] sm:$0x3f] %vm682_vm2, %v677_v49 }
 0x143   :  { %694 = vst.msk [vmem:[%s1503_s1 + $0x60] sm:$0xff] %vm680_vm3, %v676_v7  ;;  %v647_v23 = vpop.permute.xlu1 %646  ;;  %v645_v45 = vpop.permute.xlu0 %644 }
 0x144   :  { %v679_v54 = vadd.f32 %v647_v23, %v615_v42  ;;  %v678_v27 = vadd.f32 %v645_v45, %v614_v63 }
 0x146   :  { %697 = vst.msk [vmem:[%s1503_s1 + $0x78] sm:$0x3f] %vm682_vm2, %v679_v54 }
 0x147   :  { %696 = vst.msk [vmem:[%s1503_s1 + $0x70] sm:$0xff] %vm680_vm3, %v678_v27 }
 0x148   :  { %702 = vsyncpa [#allocation3], 1 }

</bundles_post_ra>
